<compile_context>
chip_gen: v6e
topology: v6e:2x2x1
jax: 0.10.0
libtpu: 0.0.40
codegen_flags: <defaults>
</compile_context>

<pallas_src>
import functools

import jax
import jax.numpy as jnp
from jax.experimental import pallas as pl
from jax.experimental.pallas import tpu as pltpu

_SUBLANE = 8


def _vmem_capacity_bytes() -> int:
    """Physical VMEM of the local chip (fallback: 64 MiB, safe on every gen)."""
    try:
        return int(pltpu.get_tpu_info().vmem_capacity_bytes)
    except Exception:
        return 64 * 1024 * 1024


def _is_v7x() -> bool:
    try:
        kind = jax.devices()[0].device_kind.lower()
        return ("v7" in kind) or ("tpu7" in kind)
    except Exception:
        return False


_VMEM_CAP = _vmem_capacity_bytes()
# Scoped-VMEM limit: above the default scoped limit, below physical VMEM.
# 64 MiB parts (v7x) -> 48 MiB; 128 MiB parts (v5e/v6e) -> 96 MiB.
_VMEM_LIMIT = max(32 * 1024 * 1024, min((_VMEM_CAP * 3) // 4, 112 * 1024 * 1024))
_IS_V7X = _is_v7x()
_core_parallel_failed = False  # set True once if CORE_PARALLEL lowering is rejected


def _speaker_loss_kernel(x_ref, tgt_ref, post_ref, nll_ref):
    # x_ref:    [TN, C] logits tile (input dtype)        (VMEM)
    # tgt_ref:  [TN, 1] i32 class targets                (VMEM)
    # post_ref: [TN, C] softmax posterior (input dtype)
    # nll_ref:  [TN, 1] f32 per-row cross-entropy
    x = x_ref[...].astype(jnp.float32)

    # Numerically stable softmax along the class (lane) axis; f32 math.
    m = jnp.max(x, axis=-1, keepdims=True)
    shifted = x - m
    e = jnp.exp(shifted)
    s = jnp.sum(e, axis=-1, keepdims=True)
    # Exact reciprocal for f32 posteriors (1e-5 tolerance); pure-EUP approx
    # reciprocal when the posterior is emitted in bf16 anyway.
    use_approx = jnp.dtype(post_ref.dtype) == jnp.dtype(jnp.bfloat16)
    inv_s = pl.reciprocal(s, approx=bool(use_approx))
    post_ref[...] = (e * inv_s).astype(post_ref.dtype)

    # Per-row NLL without materializing the full log-softmax:
    #   nll = log(s) - shifted[target]
    # (1, C) lane iota, broadcast over sublanes via the compare against [TN,1].
    cls_idx = jax.lax.broadcasted_iota(jnp.int32, (1, x.shape[-1]), 1)
    tgt = tgt_ref[...]                                  # [TN, 1]
    picked = jnp.sum(jnp.where(cls_idx == tgt, shifted, 0.0),
                     axis=-1, keepdims=True)
    nll_ref[...] = jnp.log(s) - picked


def _pick_tile_rows(n: int, c: int, itemsize: int) -> int:
    """Rows per grid step: ~2 MiB input tiles, bounded by a VMEM working-set
    budget that counts double-buffered I/O tiles *and* the f32 temporaries."""
    # Per-row working set (bytes):
    #   input tile (x2 buffers)      : 2 * c * itemsize
    #   posterior tile (x2 buffers)  : 2 * c * itemsize
    #   f32 temporaries (~4 of them) : 4 * c * 4
    bytes_per_row = 4 * c * itemsize + 16 * c
    budget = int(_VMEM_CAP * 0.45)
    max_tn_vmem = max(_SUBLANE, budget // max(1, bytes_per_row))
    tn_target = max(_SUBLANE, (2 * 1024 * 1024) // max(1, c * itemsize))
    tn = min(tn_target, max_tn_vmem)
    tn = max(_SUBLANE, (tn // _SUBLANE) * _SUBLANE)
    if tn >= n:
        return n  # single block == full array dims (always a legal block shape)
    return tn


@functools.lru_cache(maxsize=None)
def _build_speaker_loss_call(n, c, dtype_name, tn, semantics):
    dtype = jnp.dtype(dtype_name)
    grid = (pl.cdiv(n, tn),)
    return pl.pallas_call(
        _speaker_loss_kernel,
        out_shape=(
            jax.ShapeDtypeStruct((n, c), dtype),
            jax.ShapeDtypeStruct((n, 1), jnp.float32),
        ),
        grid=grid,
        in_specs=[
            pl.BlockSpec((tn, c), lambda i: (i, 0)),
            pl.BlockSpec((tn, 1), lambda i: (i, 0)),
        ],
        out_specs=(
            pl.BlockSpec((tn, c), lambda i: (i, 0)),
            pl.BlockSpec((tn, 1), lambda i: (i, 0)),
        ),
        compiler_params=pltpu.CompilerParams(
            dimension_semantics=semantics,
            vmem_limit_bytes=_VMEM_LIMIT,
        ),
    )


def _speaker_loss_pallas(logits, targets, _force_tile_rows=None):
    """logits: [N, C] f32/bf16, targets: [N] int -> (posterior [N, C], nll [N, 1] f32)."""
    global _core_parallel_failed
    n, c = logits.shape
    dtype = jnp.dtype(logits.dtype)

    if _force_tile_rows is not None:  # test hook: exercise the ragged-grid path
        tn = min(n, max(_SUBLANE, (_force_tile_rows // _SUBLANE) * _SUBLANE))
    else:
        tn = _pick_tile_rows(n, c, dtype.itemsize)
    grid0 = pl.cdiv(n, tn)

    semantics_options = []
    if _IS_V7X and not _core_parallel_failed and grid0 >= 2:
        semantics_options.append((pltpu.CORE_PARALLEL,))  # shard rows across the 2 TCs
    semantics_options.append((pltpu.PARALLEL,))

    tgt2d = targets.astype(jnp.int32).reshape(n, 1)

    last_exc = None
    for sem in semantics_options:
        try:
            call = _build_speaker_loss_call(n, c, dtype.name, tn, sem)
            return call(logits, tgt2d)
        except Exception as exc:  # fall back to plain PARALLEL if CORE_PARALLEL is rejected
            last_exc = exc
            if sem == (pltpu.CORE_PARALLEL,):
                _core_parallel_failed = True
                continue
            raise
    raise last_exc


class SpeakerLoss:
    """JAX/Pallas mirror of the PyTorch SpeakerLoss interface (canonical
    softmax + cross-entropy forward from the base-class docstring)."""

    def __init__(self):
        self.posterior = None
        self.init()

    def init(self):
        # No trainable parameters in the documented forward pass.
        pass

    def forward(self, inputs, targets):
        posterior, nll = _speaker_loss_pallas(inputs, targets)
        self.posterior = posterior
        loss = jnp.mean(nll)
        return loss

    __call__ = forward

    def get_posterior(self):
        assert self.posterior is not None
        return self.posterior

    def get_accuracy(self, targets):
        # TODO(synk): float(...) forces a host sync per call, matching .item()
        # semantics of the PyTorch reference.
        prediction = jnp.squeeze(jnp.argmax(self.get_posterior(), axis=1))
        num_correct = jnp.sum(targets == prediction)
        return float(num_correct) / targets.shape[0]

    def step(self, lambda_factor):
        pass


def _reference(logits, targets):
    post = jax.nn.softmax(logits.astype(jnp.float32), axis=1)
    logp = jax.nn.log_softmax(logits.astype(jnp.float32), axis=1)
    loss = jnp.mean(-jnp.take_along_axis(logp, targets[:, None], axis=1))
    return post, loss


if __name__ == "__main__":
    key = jax.random.PRNGKey(0)

    # Case 1: small, "nice" shape (single full block).
    k_x, k_t = jax.random.split(key)
    N, C = 8, 32
    logits = jax.random.normal(k_x, (N, C), dtype=jnp.float32)
    targets = jax.random.randint(k_t, (N,), 0, C, dtype=jnp.int32)

    loss_mod = SpeakerLoss()
    loss = loss_mod(logits, targets)
    jax.block_until_ready(loss)
    posterior = jax.block_until_ready(loss_mod.get_posterior())
    acc = loss_mod.get_accuracy(targets)

    ref_post, ref_loss = _reference(logits, targets)
    assert posterior.shape == (N, C)
    assert jnp.allclose(posterior, ref_post, atol=1e-5, rtol=1e-5)
    assert jnp.allclose(loss, ref_loss, atol=1e-5, rtol=1e-5)
    assert 0.0 <= acc <= 1.0

    # Case 2: ragged shapes (N not multiple of 8, C not multiple of 128) with
    # full-dim blocks -> no padding anywhere.
    k_x2, k_t2 = jax.random.split(jax.random.PRNGKey(1))
    N2, C2 = 10, 200
    logits2 = jax.random.normal(k_x2, (N2, C2), dtype=jnp.float32)
    targets2 = jax.random.randint(k_t2, (N2,), 0, C2, dtype=jnp.int32)

    loss2 = loss_mod(logits2, targets2)
    jax.block_until_ready(loss2)
    posterior2 = jax.block_until_ready(loss_mod.get_posterior())
    acc2 = loss_mod.get_accuracy(targets2)

    ref_post2, ref_loss2 = _reference(logits2, targets2)
    assert posterior2.shape == (N2, C2)
    assert jnp.allclose(posterior2, ref_post2, atol=1e-5, rtol=1e-5)
    assert jnp.allclose(loss2, ref_loss2, atol=1e-5, rtol=1e-5)
    assert 0.0 <= acc2 <= 1.0

    # Case 3: bf16 logits in, bf16 posterior out (f32 math, approx reciprocal).
    logits_bf16 = logits.astype(jnp.bfloat16)
    loss3 = loss_mod(logits_bf16, targets)
    jax.block_until_ready(loss3)
    posterior3 = jax.block_until_ready(loss_mod.get_posterior())
    ref_post3, ref_loss3 = _reference(logits_bf16, targets)
    assert posterior3.dtype == jnp.bfloat16
    assert jnp.allclose(posterior3.astype(jnp.float32), ref_post3, atol=1e-2, rtol=1e-2)
    assert jnp.allclose(loss3, ref_loss3, atol=1e-2, rtol=1e-2)

    # Case 4: multi-step grid with a ragged last block (forced small tile) to
    # exercise the cdiv-grid boundary-masking path at a small shape.
    k_x4, k_t4 = jax.random.split(jax.random.PRNGKey(2))
    N4, C4 = 20, 160
    logits4 = jax.random.normal(k_x4, (N4, C4), dtype=jnp.float32)
    targets4 = jax.random.randint(k_t4, (N4,), 0, C4, dtype=jnp.int32)
    posterior4, nll4 = _speaker_loss_pallas(logits4, targets4, _force_tile_rows=8)
    jax.block_until_ready(posterior4)
    loss4 = jnp.mean(nll4)
    ref_post4, ref_loss4 = _reference(logits4, targets4)
    assert posterior4.shape == (N4, C4)
    assert jnp.allclose(posterior4, ref_post4, atol=1e-5, rtol=1e-5)
    assert jnp.allclose(loss4, ref_loss4, atol=1e-5, rtol=1e-5)

    print("KERNEL_OK")
</pallas_src>

<mosaic_0001>
module attributes {stable_mosaic.version = 11 : i64} {
  func.func @_speaker_loss_kernel(%arg0: i32, %arg1: memref<8x32xf32, #tpu.memory_space<vmem>>, %arg2: memref<8x1xi32, #tpu.memory_space<vmem>>, %arg3: memref<8x32xf32, #tpu.memory_space<vmem>>, %arg4: memref<8x1xf32, #tpu.memory_space<vmem>>) attributes {dimension_semantics = [#tpu.dimension_semantics<parallel>], iteration_bounds = array<i64: 1>, scalar_prefetch = 0 : i64, scratch_operands = 0 : i64, tpu.core_type = #tpu.core_type<tc>, window_params = [{transform_indices = @transform_0, window_bounds = array<i64: 8, 32>}, {transform_indices = @transform_1, window_bounds = array<i64: 8, 1>}, {transform_indices = @transform_2, window_bounds = array<i64: 8, 32>}, {transform_indices = @transform_3, window_bounds = array<i64: 8, 1>}]} {
    %c0 = arith.constant 0 : index
    %c0_0 = arith.constant 0 : index
    %0 = vector.load %arg1[%c0, %c0_0] : memref<8x32xf32, #tpu.memory_space<vmem>>, vector<8x32xf32>
    %cst = arith.constant dense<0xFF800000> : vector<8xf32>
    %1 = vector.multi_reduction <maximumf>, %0, %cst [1] : vector<8x32xf32> to vector<8xf32>
    %2 = vector.shape_cast %1 : vector<8xf32> to vector<8x1xf32>
    %3 = vector.broadcast %2 : vector<8x1xf32> to vector<8x32xf32>
    %4 = arith.subf %0, %3 : vector<8x32xf32>
    %5 = math.exp %4 : vector<8x32xf32>
    %cst_1 = arith.constant dense<0.000000e+00> : vector<8xf32>
    %6 = vector.multi_reduction <add>, %5, %cst_1 [1] : vector<8x32xf32> to vector<8xf32>
    %7 = vector.shape_cast %6 : vector<8xf32> to vector<8x1xf32>
    %8 = tpu.reciprocal %7 : vector<8x1xf32> -> vector<8x1xf32>
    %9 = vector.broadcast %8 : vector<8x1xf32> to vector<8x32xf32>
    %10 = arith.mulf %5, %9 : vector<8x32xf32>
    %c0_2 = arith.constant 0 : index
    %c0_3 = arith.constant 0 : index
    %11 = vector.load %arg3[%c0_2, %c0_3] : memref<8x32xf32, #tpu.memory_space<vmem>>, vector<8x32xf32>
    tpu.vector_store %arg3[%c0_2, %c0_3], %10 {strides = array<i32>} : memref<8x32xf32, #tpu.memory_space<vmem>>, vector<8x32xf32>,
    %12 = tpu.iota {dimensions = array<i32: 1>} : vector<1x32xi32>
    %c0_4 = arith.constant 0 : index
    %c0_5 = arith.constant 0 : index
    %13 = vector.load %arg2[%c0_4, %c0_5] : memref<8x1xi32, #tpu.memory_space<vmem>>, vector<8x1xi32>
    %14 = vector.broadcast %12 : vector<1x32xi32> to vector<8x32xi32>
    %15 = vector.broadcast %13 : vector<8x1xi32> to vector<8x32xi32>
    %16 = arith.cmpi eq, %14, %15 : vector<8x32xi32>
    %cst_6 = arith.constant 0.000000e+00 : f32
    %17 = vector.broadcast %cst_6 : f32 to vector<8x32xf32>
    %18 = arith.select %16, %4, %17 : vector<8x32xi1>, vector<8x32xf32>
    %cst_7 = arith.constant dense<0.000000e+00> : vector<8xf32>
    %19 = vector.multi_reduction <add>, %18, %cst_7 [1] : vector<8x32xf32> to vector<8xf32>
    %20 = vector.shape_cast %19 : vector<8xf32> to vector<8x1xf32>
    %21 = math.log %7 : vector<8x1xf32>
    %22 = arith.subf %21, %20 : vector<8x1xf32>
    %c0_8 = arith.constant 0 : index
    %c0_9 = arith.constant 0 : index
    %23 = vector.load %arg4[%c0_8, %c0_9] : memref<8x1xf32, #tpu.memory_space<vmem>>, vector<8x1xf32>
    tpu.vector_store %arg4[%c0_8, %c0_9], %22 {strides = array<i32>} : memref<8x1xf32, #tpu.memory_space<vmem>>, vector<8x1xf32>,
    return
  }
  func.func @transform_0(%arg0: i32) -> (i32, i32) {
    %c0_i32 = arith.constant 0 : i32
    %c0_i32_0 = arith.constant 0 : i32
    return %arg0, %c0_i32 : i32, i32
  }
  func.func @transform_1(%arg0: i32) -> (i32, i32) {
    %c0_i32 = arith.constant 0 : i32
    %c0_i32_0 = arith.constant 0 : i32
    return %arg0, %c0_i32 : i32, i32
  }
  func.func @transform_2(%arg0: i32) -> (i32, i32) {
    %c0_i32 = arith.constant 0 : i32
    %c0_i32_0 = arith.constant 0 : i32
    return %arg0, %c0_i32 : i32, i32
  }
  func.func @transform_3(%arg0: i32) -> (i32, i32) {
    %c0_i32 = arith.constant 0 : i32
    %c0_i32_0 = arith.constant 0 : i32
    return %arg0, %c0_i32 : i32, i32
  }
}

</mosaic_0001>

<bundles_post_ra>
// kernel: tpu_custom_call.1
= control target key start
LH: loop header
LB: loop body
LE: loop exit
PB: predicated region body
PF: predicated region fallthrough
CT: control target
= control target key end

     0   :  { %vm15_vm0 = vcmask 261120   ;;  %s131_s0 = inlined_call_operand.vmem [shape: f32[8,32], index: 0, kind: input, shape index: {}]   ;;  %s132_s1 = inlined_call_operand.vmem [shape: s32[8,1], index: 1, kind: input, shape index: {}]   ;;  %s133_s2 = inlined_call_operand.hbm [shape: f32[8,32], index: 2, kind: output, shape index: {0}]   ;;  %s134_s3 = inlined_call_operand.vmem [shape: f32[8,1], index: 3, kind: output, shape index: {1}]  }
   0x1   :  { %v14_v0 = vld [vmem:[%s131_s0] sm:$0xff] }
   0x2   :  { %9 = vsyncpa [#allocation3], 0  ;;  %v16_v1 = vsel %vm15_vm0, %v14_v0, -inf  ;;  %v93_v2 = vmov 0   ;;  %v30_v3 = vld [vmem:[%s132_s1] sm:$0xff]  ;;  %v28_v7 = vlaneseq  ;;  %s94_s0 = smov [#allocation2]  }
   0x3   :  { %64 = vset.pattern.permute.xlu0 %v93_v2  ;;  %s50_s1 = sshll.u32 %s94_s0, 4  ;;  %vm42_vm2 = vcmask 7168   ;;  %s51_s1 = int_to_ptr.vmem [resolvable:$true] %s50_s1 }
   0x4   :  { %17 = vmax.xlane.f32.xlu0 %v16_v1  ;;  %v29_v8 = vand.u32 127, %v28_v7  ;;  %s71_s16 = scalar_lea.vmem %s51_s1, 128  ;;  %p76_p1 = scmp.lt.s32.totalorder %s51_s1, %s51_s1 }
   0x5   :  { %p72_p0 = scmp.ne.s32.totalorder %s51_s1, %s71_s16  ;;  %p77_p2 = scmp.lt.s32.totalorder %s71_s16, %s71_s16 }
   0x7   :  { %p78_p3 = por %p77_p2, %p76_p1 }
   0x9   :  { %p79_p4 = pnand %p78_p3, %p72_p0 }
  0x1a   :  { %32 = vperm.xlu0 %64, %v30_v3  }
  0x8d   :  { %v18_v4 = vpop.xlane.xlu0 %17 }
  0x8e   :  { %v19_v5 = vsub.f32 %v14_v0, %v18_v4 }
  0x90   :  { %v20_v6 = vmul.f32 1.442695, %v19_v5 }
  0x92   :  { %65 = vpow2.f32 %v20_v6 }
  0x95   :  { %v33_v9 = vpop.permute.xlu0 %32 }
  0x96   :  { %vm34_vm1 = vcmp.eq.s32.totalorder %v29_v8, %v33_v9 }
  0x97   :  { %v35_v12 = vsel %vm34_vm1, %v19_v5, 0.0 }
  0x98   :  { %v36_v13 = vsel %vm15_vm0, %v35_v12, 0.0 }
  0x9f   :  { %v66_v10 = vpop.eup %65 }
  0xa0   :  { %v22_v11 = vsel %vm15_vm0, %v66_v10, 0.0 }
  0xa1   :  { %23 = vadd.xlane.f32.xlu1 %v22_v11 }
  0xa5   :  { %37 = vadd.xlane.f32.xlu1 %v36_v13 }
 0x12a   :  { %v24_v14 = vpop.xlane.xlu1 %23 }
 0x12b   :  { %67 = vrcp.f32 %v24_v14 }
 0x12c   :  { %69 = vlog2.f32 %v24_v14 }
 0x12e   :  { %v38_v19 = vpop.xlane.xlu1 %37 }
 0x138   :  { %v68_v15 = vpop.eup %67 }
 0x139   :  { %v70_v16 = vpop.eup %69  ;;  %v26_v17 = vmul.f32 %v68_v15, %v66_v10 }
 0x13a   :  { %v40_v18 = vmul.f32 0.6931472, %v70_v16 }
 0x13b   :  { %27 = vst.msk [vmem:[#allocation2] sm:$0xff] %vm15_vm0, %v26_v17 }
 0x13c   :  { %v41_v20 = vsub.f32 %v40_v18, %v38_v19 }
 0x13d   :  { %82 = shalt.err (!%p79_p4)
}
 0x13e   :  { %53 = dma.vmem_to_hbm [thread:$0]  %s51_s1, 128, %s133_s2, [#allocation3]   ;;  %43 = vst.msk [vmem:[%s134_s3] sm:$0xff] %vm42_vm2, %v41_v20 }
 0x13f   :  { %91 = dma.done.wait [#allocation3], 128  }
 0x140   :  { %92 = vsyncadd [#allocation3], 4294967168 }
 0x141   :  { %61 = vsyncpa [#allocation3], 1 }

</bundles_post_ra>
